<compile_context>
chip_gen: v7x
topology: tpu7x:2x2x1
jax: 0.10.0
libtpu: 0.0.40
codegen_flags: <defaults>
</compile_context>

<pallas_src>
import jax
import jax.numpy as jnp
from jax import lax
from jax.experimental import pallas as pl
from jax.experimental.pallas import tpu as pltpu

# ----- model / problem sizes (small, consistent with policy_conv=True) -------
FEATURE_DIM = 4                       # conv in-channels
IMG = 4                               # H == W  (== feature_ratio)
HW = IMG * IMG
STATE_DIM = FEATURE_DIM * HW          # 64
CONV_OUT = 32
ENC_IN = STATE_DIM * CONV_OUT // FEATURE_DIM   # 512  (torch: state_dim*32/feature_dim)
HIDDEN = 128                          # hidden_state_dim (scaled down from 1024)
ACTION_DIM = 8
SEQ = 2
BATCH = 8
N = SEQ * BATCH
OUT_LANES = 128                       # lane-dense packed-output width


# ------------------------------ fused kernel ---------------------------------
def policy_kernel(x_ref, wconv_ref, w1_ref, b1_ref,
                  wih_ref, bih_ref, whh_ref, bhh_ref,
                  whead_ref, bhead_ref, act_ref, out_ref):
    f32 = jnp.float32
    bf16 = jnp.bfloat16
    Hd = HIDDEN

    # ---- state encoder: conv1x1 (as block-diag GEMM) + ReLU, Linear + ReLU --
    xb = x_ref[...].astype(bf16)                                   # (N, 64)
    enc = jnp.maximum(
        jnp.dot(xb, wconv_ref[...], preferred_element_type=f32), 0.0)   # (N, 512)
    feat = jnp.maximum(
        jnp.dot(enc.astype(bf16), w1_ref[...], preferred_element_type=f32)
        + b1_ref[...], 0.0)                                        # (N, 128)

    # ---- GRU: hoist the input-to-hidden GEMM out of the recurrence ----------
    gi_all = (jnp.dot(feat.astype(bf16), wih_ref[...],
                      preferred_element_type=f32) + bih_ref[...])  # (N, 3H)

    whh = whh_ref[...]                                             # (128, 384) bf16
    bhh = bhh_ref[...]                                             # (1, 384) f32
    h = jnp.zeros((BATCH, Hd), f32)
    hs = []
    for t in range(SEQ):                                           # static unroll
        gi = gi_all[t * BATCH:(t + 1) * BATCH, :]                  # (BATCH, 3H)
        gh = jnp.dot(h.astype(bf16), whh, preferred_element_type=f32) + bhh
        r = jax.nn.sigmoid(gi[:, :Hd] + gh[:, :Hd])
        z = jax.nn.sigmoid(gi[:, Hd:2 * Hd] + gh[:, Hd:2 * Hd])
        n = jnp.tanh(gi[:, 2 * Hd:] + r * gh[:, 2 * Hd:])
        h = (1.0 - z) * n + z * h                                  # f32 gate math
        hs.append(h)
    out = jnp.concatenate(hs, axis=0)                              # (N, 128)

    # ---- fused actor + critic head ------------------------------------------
    head = (jnp.dot(out.astype(bf16), whead_ref[...],
                    preferred_element_type=f32) + bhead_ref[...])  # (N, A+1)
    logits = head[:, :ACTION_DIM]                                  # (N, A)
    hcol = lax.broadcasted_iota(jnp.int32, head.shape, 1)
    value = jnp.sum(jnp.where(hcol == ACTION_DIM, head, 0.0),
                    axis=-1, keepdims=True)                        # (N, 1)

    # log-softmax / entropy / log-prob of taken action
    m = jnp.max(logits, axis=-1, keepdims=True)
    s = logits - m
    lse = jnp.log(jnp.sum(jnp.exp(s), axis=-1, keepdims=True))
    logp = s - lse
    probs = jnp.exp(logp)
    ent = -jnp.sum(probs * logp, axis=-1, keepdims=True)           # (N, 1)

    aidx = lax.broadcasted_iota(jnp.int32, logits.shape, 1)
    sel = jnp.sum(jnp.where(aidx == act_ref[...], logp, 0.0),
                  axis=-1, keepdims=True)                          # (N, 1)

    # ---- pack the three per-row scalars lane-dense into one output ----------
    col = lax.broadcasted_iota(jnp.int32, (N, OUT_LANES), 1)
    out_ref[...] = (jnp.where(col == 0, sel, 0.0)
                    + jnp.where(col == 1, value, 0.0)
                    + jnp.where(col == 2, ent, 0.0))


# ----------------------- one-time parameter preparation -----------------------
def prepare_params(params, wdtype=jnp.bfloat16):
    """All layout / transpose / cast work done ONCE, outside the hot path."""
    # conv1x1 as a block-diagonal (STATE_DIM, HW*CONV_OUT) weight so that
    # x_flat (torch NCHW flatten) @ W_big lands directly in torch's post-conv
    # flatten order (o*HW + hw); this removes the NHWC transpose and the
    # w1 column permutation entirely.
    eye = jnp.eye(HW, dtype=jnp.float32)
    w_conv_big = jnp.einsum("oc,hk->chok", params["w_conv"], eye)
    w_conv_big = w_conv_big.reshape(STATE_DIM, HW * CONV_OUT)

    w_head = jnp.concatenate([params["w_a"].T, params["w_c"].T], axis=1)   # (H, A+1)
    b_head = jnp.concatenate([params["b_a"], params["b_c"]], axis=0)       # (A+1,)

    return dict(
        w_conv_big=w_conv_big.astype(wdtype),
        w1t=params["w1"].T.astype(wdtype),                       # (ENC_IN, H)
        b1=params["b1"].reshape(1, HIDDEN).astype(jnp.float32),
        w_ih_t=params["w_ih"].T.astype(wdtype),                  # (H, 3H)
        b_ih=params["b_ih"].reshape(1, 3 * HIDDEN).astype(jnp.float32),
        w_hh_t=params["w_hh"].T.astype(wdtype),                  # (H, 3H)
        b_hh=params["b_hh"].reshape(1, 3 * HIDDEN).astype(jnp.float32),
        w_head=w_head.astype(wdtype),                            # (H, A+1)
        b_head=b_head.reshape(1, ACTION_DIM + 1).astype(jnp.float32),
    )


# ------------------------------ wrapper ---------------------------------------
def evaluate(prep, state, action):
    """state: (SEQ, BATCH, C, H, W) f32   action: (SEQ, BATCH) int32."""
    S, B = state.shape[:2]
    x_flat = state.reshape(S * B, STATE_DIM)                 # torch NCHW flatten
    act_col = action.reshape(S * B, 1).astype(jnp.int32)

    packed = pl.pallas_call(
        policy_kernel,
        out_shape=jax.ShapeDtypeStruct((S * B, OUT_LANES), jnp.float32),
        in_specs=[pl.BlockSpec(memory_space=pltpu.MemorySpace.VMEM)] * 11,
        out_specs=pl.BlockSpec(memory_space=pltpu.MemorySpace.VMEM),
    )(x_flat,
      prep["w_conv_big"], prep["w1t"], prep["b1"],
      prep["w_ih_t"], prep["b_ih"], prep["w_hh_t"], prep["b_hh"],
      prep["w_head"], prep["b_head"], act_col)

    logprobs = packed[:, 0].reshape(S, B)
    values = packed[:, 1].reshape(S, B)
    entropy = packed[:, 2].reshape(S, B)
    return logprobs, values, entropy


evaluate_jit = jax.jit(evaluate)


# ----------------------- deterministic parameter init -------------------------
def init_params(key):
    ks = jax.random.split(key, 11)
    s = 0.1
    return dict(
        w_conv=jax.random.normal(ks[0], (CONV_OUT, FEATURE_DIM), jnp.float32) * s,
        w1=jax.random.normal(ks[1], (HIDDEN, ENC_IN), jnp.float32) * s,
        b1=jax.random.normal(ks[2], (HIDDEN,), jnp.float32) * s,
        w_ih=jax.random.normal(ks[3], (3 * HIDDEN, HIDDEN), jnp.float32) * s,
        b_ih=jax.random.normal(ks[4], (3 * HIDDEN,), jnp.float32) * s,
        w_hh=jax.random.normal(ks[5], (3 * HIDDEN, HIDDEN), jnp.float32) * s,
        b_hh=jax.random.normal(ks[6], (3 * HIDDEN,), jnp.float32) * s,
        w_a=jax.random.normal(ks[7], (ACTION_DIM, HIDDEN), jnp.float32) * s,
        b_a=jax.random.normal(ks[8], (ACTION_DIM,), jnp.float32) * s,
        w_c=jax.random.normal(ks[9], (1, HIDDEN), jnp.float32) * s,
        b_c=jax.random.normal(ks[10], (1,), jnp.float32) * s,
    )


# ----------------------------- pure-JAX f32 reference --------------------------
def reference(params, state, action):
    S, B = state.shape[:2]
    x = state.reshape(S * B, FEATURE_DIM, IMG, IMG)
    conv = jnp.einsum("nchw,oc->nohw", x, params["w_conv"])
    conv = jnp.maximum(conv, 0.0).reshape(S * B, CONV_OUT * HW)      # torch flatten
    feat = jnp.maximum(conv @ params["w1"].T + params["b1"], 0.0).reshape(S, B, HIDDEN)
    h = jnp.zeros((B, HIDDEN), jnp.float32)
    outs = []
    for t in range(S):
        gi = feat[t] @ params["w_ih"].T + params["b_ih"]
        gh = h @ params["w_hh"].T + params["b_hh"]
        r = jax.nn.sigmoid(gi[:, :HIDDEN] + gh[:, :HIDDEN])
        z = jax.nn.sigmoid(gi[:, HIDDEN:2 * HIDDEN] + gh[:, HIDDEN:2 * HIDDEN])
        n = jnp.tanh(gi[:, 2 * HIDDEN:] + r * gh[:, 2 * HIDDEN:])
        h = (1.0 - z) * n + z * h
        outs.append(h)
    out = jnp.concatenate(outs, axis=0)
    logits = out @ params["w_a"].T + params["b_a"]
    logp = jax.nn.log_softmax(logits, axis=-1)
    probs = jnp.exp(logp)
    ent = -jnp.sum(probs * logp, axis=-1)
    a = action.reshape(S * B)
    lp = jnp.take_along_axis(logp, a[:, None], axis=1)[:, 0]
    val = (out @ params["w_c"].T + params["b_c"])[:, 0]
    return lp.reshape(S, B), val.reshape(S, B), ent.reshape(S, B)


if __name__ == "__main__":
    key = jax.random.PRNGKey(0)
    pk, sk, ak = jax.random.split(key, 3)
    params = init_params(pk)
    prep = prepare_params(params)      # one-time layout / bf16 cast work
    state = jax.random.normal(sk, (SEQ, BATCH, FEATURE_DIM, IMG, IMG), jnp.float32)
    action = jax.random.randint(ak, (SEQ, BATCH), 0, ACTION_DIM)

    lp, val, ent = jax.block_until_ready(evaluate_jit(prep, state, action))
    lp_r, val_r, ent_r = reference(params, state, action)

    assert lp.shape == (SEQ, BATCH) and val.shape == (SEQ, BATCH) and ent.shape == (SEQ, BATCH)
    # bf16 weights in the kernel vs f32 reference -> slightly looser tolerance
    assert jnp.allclose(lp, lp_r, rtol=2e-2, atol=2e-2)
    assert jnp.allclose(val, val_r, rtol=2e-2, atol=2e-2)
    assert jnp.allclose(ent, ent_r, rtol=2e-2, atol=2e-2)
    print("KERNEL_OK")
</pallas_src>

<mosaic_0001>
module attributes {stable_mosaic.version = 11 : i64} {
  func.func @policy_kernel(%arg0: memref<16x64xf32, #tpu.memory_space<vmem>>, %arg1: memref<64x512xbf16, #tpu.memory_space<vmem>>, %arg2: memref<512x128xbf16, #tpu.memory_space<vmem>>, %arg3: memref<1x128xf32, #tpu.memory_space<vmem>>, %arg4: memref<128x384xbf16, #tpu.memory_space<vmem>>, %arg5: memref<1x384xf32, #tpu.memory_space<vmem>>, %arg6: memref<128x384xbf16, #tpu.memory_space<vmem>>, %arg7: memref<1x384xf32, #tpu.memory_space<vmem>>, %arg8: memref<128x9xbf16, #tpu.memory_space<vmem>>, %arg9: memref<1x9xf32, #tpu.memory_space<vmem>>, %arg10: memref<16x1xi32, #tpu.memory_space<vmem>>, %arg11: memref<16x128xf32, #tpu.memory_space<vmem>>) attributes {dimension_semantics = [], scalar_prefetch = 0 : i64, scratch_operands = 0 : i64, tpu.core_type = #tpu.core_type<tc>} {
    %c0 = arith.constant 0 : index
    %c0_0 = arith.constant 0 : index
    %0 = vector.load %arg0[%c0, %c0_0] : memref<16x64xf32, #tpu.memory_space<vmem>>, vector<16x64xf32>
    %1 = arith.truncf %0 : vector<16x64xf32> to vector<16x64xbf16>
    %c0_1 = arith.constant 0 : index
    %c0_2 = arith.constant 0 : index
    %2 = vector.load %arg1[%c0_1, %c0_2] : memref<64x512xbf16, #tpu.memory_space<vmem>>, vector<64x512xbf16>
    %cst = arith.constant dense<0.000000e+00> : vector<16x512xf32>
    %3 = tpu.matmul %1, %2, %cst {dimension_numbers = #tpu.dot_dimension_numbers<[1], [0], [0], [1], [0, 0, 1, 1], [], []>} : vector<16x64xbf16>, vector<64x512xbf16>, vector<16x512xf32> -> vector<16x512xf32>
    %cst_3 = arith.constant 0.000000e+00 : f32
    %4 = vector.broadcast %cst_3 : f32 to vector<16x512xf32>
    %5 = arith.maximumf %3, %4 : vector<16x512xf32>
    %6 = arith.truncf %5 : vector<16x512xf32> to vector<16x512xbf16>
    %c0_4 = arith.constant 0 : index
    %c0_5 = arith.constant 0 : index
    %7 = vector.load %arg2[%c0_4, %c0_5] : memref<512x128xbf16, #tpu.memory_space<vmem>>, vector<512x128xbf16>
    %cst_6 = arith.constant dense<0.000000e+00> : vector<16x128xf32>
    %8 = tpu.matmul %6, %7, %cst_6 {dimension_numbers = #tpu.dot_dimension_numbers<[1], [0], [0], [1], [0, 0, 1, 1], [], []>} : vector<16x512xbf16>, vector<512x128xbf16>, vector<16x128xf32> -> vector<16x128xf32>
    %c0_7 = arith.constant 0 : index
    %c0_8 = arith.constant 0 : index
    %9 = vector.load %arg3[%c0_7, %c0_8] : memref<1x128xf32, #tpu.memory_space<vmem>>, vector<1x128xf32>
    %10 = vector.broadcast %9 : vector<1x128xf32> to vector<16x128xf32>
    %11 = arith.addf %8, %10 : vector<16x128xf32>
    %cst_9 = arith.constant 0.000000e+00 : f32
    %12 = vector.broadcast %cst_9 : f32 to vector<16x128xf32>
    %13 = arith.maximumf %11, %12 : vector<16x128xf32>
    %14 = arith.truncf %13 : vector<16x128xf32> to vector<16x128xbf16>
    %c0_10 = arith.constant 0 : index
    %c0_11 = arith.constant 0 : index
    %15 = vector.load %arg4[%c0_10, %c0_11] : memref<128x384xbf16, #tpu.memory_space<vmem>>, vector<128x384xbf16>
    %cst_12 = arith.constant dense<0.000000e+00> : vector<16x384xf32>
    %16 = tpu.matmul %14, %15, %cst_12 {dimension_numbers = #tpu.dot_dimension_numbers<[1], [0], [0], [1], [0, 0, 1, 1], [], []>} : vector<16x128xbf16>, vector<128x384xbf16>, vector<16x384xf32> -> vector<16x384xf32>
    %c0_13 = arith.constant 0 : index
    %c0_14 = arith.constant 0 : index
    %17 = vector.load %arg5[%c0_13, %c0_14] : memref<1x384xf32, #tpu.memory_space<vmem>>, vector<1x384xf32>
    %18 = vector.broadcast %17 : vector<1x384xf32> to vector<16x384xf32>
    %19 = arith.addf %16, %18 : vector<16x384xf32>
    %c0_15 = arith.constant 0 : index
    %c0_16 = arith.constant 0 : index
    %20 = vector.load %arg6[%c0_15, %c0_16] : memref<128x384xbf16, #tpu.memory_space<vmem>>, vector<128x384xbf16>
    %c0_17 = arith.constant 0 : index
    %c0_18 = arith.constant 0 : index
    %21 = vector.load %arg7[%c0_17, %c0_18] : memref<1x384xf32, #tpu.memory_space<vmem>>, vector<1x384xf32>
    %cst_19 = arith.constant 0.000000e+00 : f32
    %22 = vector.broadcast %cst_19 : f32 to vector<8x128xf32>
    %23 = vector.extract_strided_slice %19 {offsets = [0, 0], sizes = [8, 384], strides = [1, 1]} : vector<16x384xf32> to vector<8x384xf32>
    %24 = arith.truncf %22 : vector<8x128xf32> to vector<8x128xbf16>
    %cst_20 = arith.constant dense<0.000000e+00> : vector<8x384xf32>
    %25 = tpu.matmul %24, %20, %cst_20 {dimension_numbers = #tpu.dot_dimension_numbers<[1], [0], [0], [1], [0, 0, 1, 1], [], []>} : vector<8x128xbf16>, vector<128x384xbf16>, vector<8x384xf32> -> vector<8x384xf32>
    %26 = vector.broadcast %21 : vector<1x384xf32> to vector<8x384xf32>
    %27 = arith.addf %25, %26 : vector<8x384xf32>
    %28 = vector.extract_strided_slice %23 {offsets = [0, 0], sizes = [8, 128], strides = [1, 1]} : vector<8x384xf32> to vector<8x128xf32>
    %29 = vector.extract_strided_slice %27 {offsets = [0, 0], sizes = [8, 128], strides = [1, 1]} : vector<8x384xf32> to vector<8x128xf32>
    %30 = arith.addf %28, %29 : vector<8x128xf32>
    %31 = arith.negf %30 : vector<8x128xf32>
    %32 = math.exp %31 : vector<8x128xf32>
    %cst_21 = arith.constant 1.000000e+00 : f32
    %33 = vector.broadcast %cst_21 : f32 to vector<8x128xf32>
    %34 = arith.addf %33, %32 : vector<8x128xf32>
    %35 = arith.divf %33, %34 : vector<8x128xf32>
    %36 = vector.extract_strided_slice %23 {offsets = [0, 128], sizes = [8, 128], strides = [1, 1]} : vector<8x384xf32> to vector<8x128xf32>
    %37 = vector.extract_strided_slice %27 {offsets = [0, 128], sizes = [8, 128], strides = [1, 1]} : vector<8x384xf32> to vector<8x128xf32>
    %38 = arith.addf %36, %37 : vector<8x128xf32>
    %39 = arith.negf %38 : vector<8x128xf32>
    %40 = math.exp %39 : vector<8x128xf32>
    %cst_22 = arith.constant 1.000000e+00 : f32
    %41 = vector.broadcast %cst_22 : f32 to vector<8x128xf32>
    %42 = arith.addf %41, %40 : vector<8x128xf32>
    %43 = arith.divf %41, %42 : vector<8x128xf32>
    %44 = vector.extract_strided_slice %23 {offsets = [0, 256], sizes = [8, 128], strides = [1, 1]} : vector<8x384xf32> to vector<8x128xf32>
    %45 = vector.extract_strided_slice %27 {offsets = [0, 256], sizes = [8, 128], strides = [1, 1]} : vector<8x384xf32> to vector<8x128xf32>
    %46 = arith.mulf %35, %45 : vector<8x128xf32>
    %47 = arith.addf %44, %46 : vector<8x128xf32>
    %48 = math.tanh %47 : vector<8x128xf32>
    %cst_23 = arith.constant 1.000000e+00 : f32
    %49 = vector.broadcast %cst_23 : f32 to vector<8x128xf32>
    %50 = arith.subf %49, %43 : vector<8x128xf32>
    %51 = arith.mulf %50, %48 : vector<8x128xf32>
    %52 = arith.mulf %43, %22 : vector<8x128xf32>
    %53 = arith.addf %51, %52 : vector<8x128xf32>
    %54 = vector.extract_strided_slice %19 {offsets = [8, 0], sizes = [8, 384], strides = [1, 1]} : vector<16x384xf32> to vector<8x384xf32>
    %55 = arith.truncf %53 : vector<8x128xf32> to vector<8x128xbf16>
    %cst_24 = arith.constant dense<0.000000e+00> : vector<8x384xf32>
    %56 = tpu.matmul %55, %20, %cst_24 {dimension_numbers = #tpu.dot_dimension_numbers<[1], [0], [0], [1], [0, 0, 1, 1], [], []>} : vector<8x128xbf16>, vector<128x384xbf16>, vector<8x384xf32> -> vector<8x384xf32>
    %57 = vector.broadcast %21 : vector<1x384xf32> to vector<8x384xf32>
    %58 = arith.addf %56, %57 : vector<8x384xf32>
    %59 = vector.extract_strided_slice %54 {offsets = [0, 0], sizes = [8, 128], strides = [1, 1]} : vector<8x384xf32> to vector<8x128xf32>
    %60 = vector.extract_strided_slice %58 {offsets = [0, 0], sizes = [8, 128], strides = [1, 1]} : vector<8x384xf32> to vector<8x128xf32>
    %61 = arith.addf %59, %60 : vector<8x128xf32>
    %62 = arith.negf %61 : vector<8x128xf32>
    %63 = math.exp %62 : vector<8x128xf32>
    %cst_25 = arith.constant 1.000000e+00 : f32
    %64 = vector.broadcast %cst_25 : f32 to vector<8x128xf32>
    %65 = arith.addf %64, %63 : vector<8x128xf32>
    %66 = arith.divf %64, %65 : vector<8x128xf32>
    %67 = vector.extract_strided_slice %54 {offsets = [0, 128], sizes = [8, 128], strides = [1, 1]} : vector<8x384xf32> to vector<8x128xf32>
    %68 = vector.extract_strided_slice %58 {offsets = [0, 128], sizes = [8, 128], strides = [1, 1]} : vector<8x384xf32> to vector<8x128xf32>
    %69 = arith.addf %67, %68 : vector<8x128xf32>
    %70 = arith.negf %69 : vector<8x128xf32>
    %71 = math.exp %70 : vector<8x128xf32>
    %cst_26 = arith.constant 1.000000e+00 : f32
    %72 = vector.broadcast %cst_26 : f32 to vector<8x128xf32>
    %73 = arith.addf %72, %71 : vector<8x128xf32>
    %74 = arith.divf %72, %73 : vector<8x128xf32>
    %75 = vector.extract_strided_slice %54 {offsets = [0, 256], sizes = [8, 128], strides = [1, 1]} : vector<8x384xf32> to vector<8x128xf32>
    %76 = vector.extract_strided_slice %58 {offsets = [0, 256], sizes = [8, 128], strides = [1, 1]} : vector<8x384xf32> to vector<8x128xf32>
    %77 = arith.mulf %66, %76 : vector<8x128xf32>
    %78 = arith.addf %75, %77 : vector<8x128xf32>
    %79 = math.tanh %78 : vector<8x128xf32>
    %cst_27 = arith.constant 1.000000e+00 : f32
    %80 = vector.broadcast %cst_27 : f32 to vector<8x128xf32>
    %81 = arith.subf %80, %74 : vector<8x128xf32>
    %82 = arith.mulf %81, %79 : vector<8x128xf32>
    %83 = arith.mulf %74, %53 : vector<8x128xf32>
    %84 = arith.addf %82, %83 : vector<8x128xf32>
    %85 = tpu.concatenate %53, %84 in 0 : vector<8x128xf32>, vector<8x128xf32> -> vector<16x128xf32>
    %86 = arith.truncf %85 : vector<16x128xf32> to vector<16x128xbf16>
    %c0_28 = arith.constant 0 : index
    %c0_29 = arith.constant 0 : index
    %87 = vector.load %arg8[%c0_28, %c0_29] : memref<128x9xbf16, #tpu.memory_space<vmem>>, vector<128x9xbf16>
    %cst_30 = arith.constant dense<0.000000e+00> : vector<16x9xf32>
    %88 = tpu.matmul %86, %87, %cst_30 {dimension_numbers = #tpu.dot_dimension_numbers<[1], [0], [0], [1], [0, 0, 1, 1], [], []>} : vector<16x128xbf16>, vector<128x9xbf16>, vector<16x9xf32> -> vector<16x9xf32>
    %c0_31 = arith.constant 0 : index
    %c0_32 = arith.constant 0 : index
    %89 = vector.load %arg9[%c0_31, %c0_32] : memref<1x9xf32, #tpu.memory_space<vmem>>, vector<1x9xf32>
    %90 = vector.broadcast %89 : vector<1x9xf32> to vector<16x9xf32>
    %91 = arith.addf %88, %90 : vector<16x9xf32>
    %92 = vector.extract_strided_slice %91 {offsets = [0, 0], sizes = [16, 8], strides = [1, 1]} : vector<16x9xf32> to vector<16x8xf32>
    %93 = tpu.iota {dimensions = array<i32: 1>} : vector<16x9xi32>
    %c8_i32 = arith.constant 8 : i32
    %94 = vector.broadcast %c8_i32 : i32 to vector<16x9xi32>
    %95 = arith.cmpi eq, %93, %94 : vector<16x9xi32>
    %cst_33 = arith.constant 0.000000e+00 : f32
    %96 = vector.broadcast %cst_33 : f32 to vector<16x9xf32>
    %97 = arith.select %95, %91, %96 : vector<16x9xi1>, vector<16x9xf32>
    %cst_34 = arith.constant dense<0.000000e+00> : vector<16xf32>
    %98 = vector.multi_reduction <add>, %97, %cst_34 [1] : vector<16x9xf32> to vector<16xf32>
    %99 = vector.shape_cast %98 : vector<16xf32> to vector<16x1xf32>
    %cst_35 = arith.constant dense<0xFF800000> : vector<16xf32>
    %100 = vector.multi_reduction <maximumf>, %92, %cst_35 [1] : vector<16x8xf32> to vector<16xf32>
    %101 = vector.shape_cast %100 : vector<16xf32> to vector<16x1xf32>
    %102 = vector.broadcast %101 : vector<16x1xf32> to vector<16x8xf32>
    %103 = arith.subf %92, %102 : vector<16x8xf32>
    %104 = math.exp %103 : vector<16x8xf32>
    %cst_36 = arith.constant dense<0.000000e+00> : vector<16xf32>
    %105 = vector.multi_reduction <add>, %104, %cst_36 [1] : vector<16x8xf32> to vector<16xf32>
    %106 = vector.shape_cast %105 : vector<16xf32> to vector<16x1xf32>
    %107 = math.log %106 : vector<16x1xf32>
    %108 = vector.broadcast %107 : vector<16x1xf32> to vector<16x8xf32>
    %109 = arith.subf %103, %108 : vector<16x8xf32>
    %110 = math.exp %109 : vector<16x8xf32>
    %111 = arith.mulf %110, %109 : vector<16x8xf32>
    %cst_37 = arith.constant dense<0.000000e+00> : vector<16xf32>
    %112 = vector.multi_reduction <add>, %111, %cst_37 [1] : vector<16x8xf32> to vector<16xf32>
    %113 = vector.shape_cast %112 : vector<16xf32> to vector<16x1xf32>
    %cst_38 = arith.constant 0.000000e+00 : f32
    %114 = vector.broadcast %cst_38 : f32 to vector<16x1xf32>
    %115 = arith.subf %114, %113 : vector<16x1xf32>
    %116 = tpu.iota {dimensions = array<i32: 1>} : vector<16x8xi32>
    %c0_39 = arith.constant 0 : index
    %c0_40 = arith.constant 0 : index
    %117 = vector.load %arg10[%c0_39, %c0_40] : memref<16x1xi32, #tpu.memory_space<vmem>>, vector<16x1xi32>
    %118 = vector.broadcast %117 : vector<16x1xi32> to vector<16x8xi32>
    %119 = arith.cmpi eq, %116, %118 : vector<16x8xi32>
    %cst_41 = arith.constant 0.000000e+00 : f32
    %120 = vector.broadcast %cst_41 : f32 to vector<16x8xf32>
    %121 = arith.select %119, %109, %120 : vector<16x8xi1>, vector<16x8xf32>
    %cst_42 = arith.constant dense<0.000000e+00> : vector<16xf32>
    %122 = vector.multi_reduction <add>, %121, %cst_42 [1] : vector<16x8xf32> to vector<16xf32>
    %123 = vector.shape_cast %122 : vector<16xf32> to vector<16x1xf32>
    %124 = tpu.iota {dimensions = array<i32: 1>} : vector<16x128xi32>
    %c0_i32 = arith.constant 0 : i32
    %125 = vector.broadcast %c0_i32 : i32 to vector<16x128xi32>
    %126 = arith.cmpi eq, %124, %125 : vector<16x128xi32>
    %cst_43 = arith.constant 0.000000e+00 : f32
    %127 = vector.shape_cast %123 : vector<16x1xf32> to vector<16x1xf32>
    %128 = vector.broadcast %127 : vector<16x1xf32> to vector<16x128xf32>
    %129 = vector.broadcast %cst_43 : f32 to vector<16x128xf32>
    %130 = arith.select %126, %128, %129 : vector<16x128xi1>, vector<16x128xf32>
    %c1_i32 = arith.constant 1 : i32
    %131 = vector.broadcast %c1_i32 : i32 to vector<16x128xi32>
    %132 = arith.cmpi eq, %124, %131 : vector<16x128xi32>
    %cst_44 = arith.constant 0.000000e+00 : f32
    %133 = vector.shape_cast %99 : vector<16x1xf32> to vector<16x1xf32>
    %134 = vector.broadcast %133 : vector<16x1xf32> to vector<16x128xf32>
    %135 = vector.broadcast %cst_44 : f32 to vector<16x128xf32>
    %136 = arith.select %132, %134, %135 : vector<16x128xi1>, vector<16x128xf32>
    %137 = arith.addf %130, %136 : vector<16x128xf32>
    %c2_i32 = arith.constant 2 : i32
    %138 = vector.broadcast %c2_i32 : i32 to vector<16x128xi32>
    %139 = arith.cmpi eq, %124, %138 : vector<16x128xi32>
    %cst_45 = arith.constant 0.000000e+00 : f32
    %140 = vector.shape_cast %115 : vector<16x1xf32> to vector<16x1xf32>
    %141 = vector.broadcast %140 : vector<16x1xf32> to vector<16x128xf32>
    %142 = vector.broadcast %cst_45 : f32 to vector<16x128xf32>
    %143 = arith.select %139, %141, %142 : vector<16x128xi1>, vector<16x128xf32>
    %144 = arith.addf %137, %143 : vector<16x128xf32>
    %c0_46 = arith.constant 0 : index
    %c0_47 = arith.constant 0 : index
    %145 = vector.load %arg11[%c0_46, %c0_47] : memref<16x128xf32, #tpu.memory_space<vmem>>, vector<16x128xf32>
    tpu.vector_store %arg11[%c0_46, %c0_47], %144 {strides = array<i32>} : memref<16x128xf32, #tpu.memory_space<vmem>>, vector<16x128xf32>,
    return
  }
}

</mosaic_0001>

<bundles_post_ra>
// kernel: squeeze.3
= control target key start
LH: loop header
LB: loop body
LE: loop exit
PB: predicated region body
PF: predicated region fallthrough
CT: control target
= control target key end

     0   :  { %s85_s0 = inlined_call_operand.vmem [shape: f32[16], index: 0, kind: input, shape index: {}]   ;;  %s86_s1 = inlined_call_operand.hbm [shape: f32[2,8], index: 1, kind: output, shape index: {}]  }
   0x1   :  { %v5_v0 = vld [vmem:[%s85_s0] sm:$0x1] }
   0x2   :  { %2 = vsyncpa [#allocation1], 0  ;;  %6 = vst [vmem:[#allocation3] sm:$0x1] %v5_v0  ;;  %vm8_vm0 = vcmask 64512   ;;  %s58_s0 = smov 120  }
   0x3   :  { %s59_s8 = smov [#allocation0]  }
   0x4   :  { %s26_s9 = sshll.u32 %s59_s8, 4  ;;  %s27_s9 = int_to_ptr.vmem [resolvable:$true] %s26_s9 }
   0x5   :  { %s34_s10 = scalar_lea.vmem %s27_s9, 32  ;;  %p39_p1 = scmp.lt.s32.totalorder %s27_s9, %s27_s9 }
   0x6   :  { %p35_p0 = scmp.ne.s32.totalorder %s27_s9, %s34_s10  ;;  %p40_p2 = scmp.lt.s32.totalorder %s34_s10, %s34_s10 }
   0x8   :  { %p41_p3 = por %p40_p2, %p39_p1 }
   0x9   :  { %v10_v1 = vld [vmem:[#allocation3] sm:$0x1]  }
   0xa   :  { %v7_v2 = vld [vmem:[#allocation3] sm:$0x1]   ;;  %11 = vrot.lane.b32.xlu0 %v10_v1, %s58_s0  ;;  %p42_p4 = pnand %p41_p3, %p35_p0 }
   0xb   :  { %9 = vst.msk [vmem:[#allocation2] sm:$0x1] %vm8_vm0, %v7_v2  }
  0x7c   :  { %v12_v3 = vpop.permute.xlu0 %11  }
  0x7d   :  { %15 = vst.msk [vmem:[#allocation2 + $0x1] sm:$0x1] %vm8_vm0, %v12_v3  }
  0x84   :  { %v19_v4 = vld [vmem:[#allocation2] sm:$0x3] }
  0x85   :  { %21 = vst [vmem:[#allocation0] sm:$0x3] %v19_v4 }
  0x86   :  { %45 = shalt.err (!%p42_p4)
}
  0x87   :  { %s46_s13 = scalar_lea.hbm %s86_s1, 32 }
  0x88   :  { %p47_p5 = scmp.ne.s32.totalorder %s86_s1, %s46_s13  ;;  %p50_p6 = scmp.lt.u32.totalorder %s46_s13, %s86_s1 }
  0x8a   :  { %p52_p7 = pnand %p50_p6, %p47_p5 }
  0x8c   :  { %55 = shalt.err (!%p52_p7)
}
  0x8d   :  { %29 = dma.vmem_to_hbm [thread:$0]  %s27_s9, 32, %s86_s1, [#allocation1]  }
  0x8e   :  { %56 = dma.done.wait [#allocation1], 32  }
  0x8f   :  { %57 = vsyncadd [#allocation1], 4294967264 }
  0x90   :  { %31 = vsyncpa [#allocation1], 1 }

// kernel: evaluate.1
= control target key start
LH: loop header
LB: loop body
LE: loop exit
PB: predicated region body
PF: predicated region fallthrough
CT: control target
= control target key end

     0   :  { %16 = vsyncpa [#allocation3], 0  ;;  %s1911_s17 = smov [#allocation2]   ;;  %s2357_s0 = inlined_call_operand.vmem [shape: f32[16,64], index: 0, kind: input, shape index: {}]   ;;  %s2358_s1 = inlined_call_operand.vmem [shape: bf16[64,512], index: 1, kind: input, shape index: {}]   ;;  %s2359_s2 = inlined_call_operand.vmem [shape: bf16[512,128], index: 2, kind: input, shape index: {}]   ;;  %s2360_s3 = inlined_call_operand.vmem [shape: f32[1,128], index: 3, kind: input, shape index: {}]   ;;  %s2361_s4 = inlined_call_operand.vmem [shape: bf16[128,384], index: 4, kind: input, shape index: {}]   ;;  %s2362_s5 = inlined_call_operand.vmem [shape: f32[1,384], index: 5, kind: input, shape index: {}]   ;;  %s2363_s6 = inlined_call_operand.hbm [shape: bf16[128,384], index: 6, kind: input, shape index: {}]   ;;  %s2364_s7 = inlined_call_operand.vmem [shape: f32[1,384], index: 7, kind: input, shape index: {}]   ;;  %s2365_s8 = inlined_call_operand.vmem [shape: bf16[128,9], index: 8, kind: input, shape index: {}]   ;;  %s2366_s9 = inlined_call_operand.vmem [shape: f32[1,9], index: 9, kind: input, shape index: {}]   ;;  %s2367_s10 = inlined_call_operand.vmem [shape: s32[16,1], index: 10, kind: input, shape index: {}]   ;;  %s2368_s11 = inlined_call_operand.vmem [shape: f32[16,128], index: 11, kind: output, shape index: {}]  }
   0x1   :  { %s34_s18 = sshll.u32 %s1911_s17, 4  ;;  %s1887_s21 = scalar_lea.hbm %s2363_s6, 3072  ;;  %s35_s18 = int_to_ptr.vmem [resolvable:$true] %s34_s18 }
   0x2   :  { %p1888_p0 = scmp.ne.s32.totalorder %s2363_s6, %s1887_s21  ;;  %p1891_p1 = scmp.lt.u32.totalorder %s1887_s21, %s2363_s6 }
   0x4   :  { %p1893_p2 = pnand %p1891_p1, %p1888_p0 }
   0x6   :  { %1896 = shalt.err (!%p1893_p2)
}
   0x7   :  { %s1897_s26 = scalar_lea.vmem %s35_s18, 3072  ;;  %p1902_p4 = scmp.lt.s32.totalorder %s35_s18, %s35_s18 }
   0x8   :  { %p1898_p3 = scmp.ne.s32.totalorder %s35_s18, %s1897_s26  ;;  %p1903_p5 = scmp.lt.s32.totalorder %s1897_s26, %s1897_s26 }
   0xa   :  { %p1904_p6 = por %p1903_p5, %p1902_p4 }
   0xc   :  { %p1905_p7 = pnand %p1904_p6, %p1898_p3 }
   0xe   :  { %1908 = shalt.err (!%p1905_p7)
}
   0xf   :  { %s1912_s27 = smov 192   ;;  %s1913_s28 = smov 12  }
  0x10   :  { %40 = dma.hbm_to_vmem [thread:$0]  %s2363_s6, 3072, %s35_s18, [#allocation3], %s1912_s27, %s1912_s27, %s1913_s28  }
  0x11   :  { %1909 = dma.done.wait [#allocation3], 3072  }
  0x12   :  { %1910 = vsyncadd [#allocation3], 4294964224  ;;  %v1914_v0 = vmov 0   ;;  %v1727_v1 = vld [vmem:[%s2358_s1 + $0x4] ss:$16 sps:$4 sm:$0xff]   ;;  %v54_v10 = vld [vmem:[%s2357_s0 + $0x8] sm:$0xff] }
  0x13   :  { %188 = vmatprep.mubr.bf16.mxu1 %v1914_v0  ;;  %1725 = vset.pattern.permute.xlu0 %v1914_v0  ;;  %v1729_v2 = vld [vmem:[%s2358_s1] ss:$16 sps:$4 sm:$0xff]   ;;  %v1730_v3 = vld [vmem:[%s2358_s1 + $0x24] ss:$16 sps:$4 sm:$0xff]   ;;  %v1741_v11 = vld [vmem:[%s2358_s1 + $0xc] ss:$16 sps:$4 sm:$0xff]  }
  0x14   :  { %1726 = vset.pattern.permute.xlu1 %v1914_v0  ;;  %156 = vmatprep.subr.bf16.mxu1 %v1727_v1  ;;  %v1732_v4 = vld [vmem:[%s2358_s1 + $0x20] ss:$16 sps:$4 sm:$0xff]   ;;  %v1733_v5 = vld [vmem:[%s2358_s1 + $0x44] ss:$16 sps:$4 sm:$0xff]   ;;  %v1739_v13 = vld [vmem:[%s2358_s1 + $0x8] ss:$16 sps:$4 sm:$0xff]  }
  0x15   :  { %157 = vmatpush1.bf16.msra.mxu1 %v1729_v2  ;;  %v1735_v6 = vld [vmem:[%s2358_s1 + $0x40] ss:$16 sps:$4 sm:$0xff]   ;;  %v1736_v7 = vld [vmem:[%s2358_s1 + $0x64] ss:$16 sps:$4 sm:$0xff]   ;;  %vm152_vm0 = vcmask 523264   ;;  %v1753_v16 = vld [vmem:[%s2359_s2 + $0x48] sm:$0xff]  }
  0x16   :  { %158 = vmatprep.subr.bf16.mxu1 %v1730_v3  ;;  %v1738_v8 = vld [vmem:[%s2358_s1 + $0x60] ss:$16 sps:$4 sm:$0xff]   ;;  %v1744_v17 = vld [vmem:[%s2358_s1 + $0x2c] ss:$16 sps:$4 sm:$0xff]   ;;  %v1742_v20 = vld [vmem:[%s2358_s1 + $0x28] ss:$16 sps:$4 sm:$0xff]  }
  0x17   :  { %v53_v9 = vld [vmem:[%s2357_s0] sm:$0xff]  ;;  %v1754_v18 = vld [vmem:[%s2359_s2 + $0x8] sm:$0xff]   ;;  %v1755_v19 = vld [vmem:[%s2359_s2 + $0x50] sm:$0xff]   ;;  %v1915_v53 = vmov 0.0   ;;  %vm1916_vm1 = vmmov 0   ;;  %vm1370_vm2 = vcmask 64512  }
  0x18   :  { %v1751_v12 = vld [vmem:[%s2359_s2 + $0x40] sm:$0xff]   ;;  %v55_v15 = vpack.c.bf16 %v54_v10, %v53_v9  ;;  %v1747_v21 = vld [vmem:[%s2358_s1 + $0x4c] ss:$16 sps:$4 sm:$0xff]   ;;  %v1756_v22 = vld [vmem:[%s2359_s2 + $0x10] sm:$0xff]   ;;  %vm1363_vm4 = vcmask 72704  }
  0x19   :  { %159 = vmatpush1.bf16.msra.mxu1 %v1732_v4  ;;  %v1752_v14 = vld [vmem:[%s2359_s2] sm:$0xff]   ;;  %1559 = vmatprep.subr.bf16.mxu0 %v1751_v12  ;;  %v1757_v23 = vld [vmem:[%s2359_s2 + $0x58] sm:$0xff]   ;;  %v1763_v31 = vld [vmem:[%s2359_s2 + $0x68] sm:$0xff]  }
  0x1a   :  { %160 = vmatprep.subr.bf16.mxu1 %v1733_v5  ;;  %1560 = vmatpush3.bf16.msra.mxu0 %v1752_v14  ;;  %v1745_v24 = vld [vmem:[%s2358_s1 + $0x48] ss:$16 sps:$4 sm:$0xff]   ;;  %v1750_v25 = vld [vmem:[%s2358_s1 + $0x6c] ss:$16 sps:$4 sm:$0xff]   ;;  %v1759_v28 = vld [vmem:[%s2359_s2 + $0x60] sm:$0xff]  }
  0x1b   :  { %1561 = vmatprep.subr.bf16.mxu0 %v1753_v16  ;;  %v1758_v26 = vld [vmem:[%s2359_s2 + $0x18] sm:$0xff]   ;;  %v1760_v29 = vld [vmem:[%s2359_s2 + $0xc0] sm:$0xff]   ;;  %v1764_v33 = vld [vmem:[%s2359_s2 + $0xc8] sm:$0xff]  }
  0x1c   :  { %v1748_v27 = vld [vmem:[%s2358_s1 + $0x68] ss:$16 sps:$4 sm:$0xff]   ;;  %v1761_v30 = vld [vmem:[%s2359_s2 + $0x20] sm:$0xff]   ;;  %v1767_v36 = vld [vmem:[%s2359_s2 + $0x70] sm:$0xff]  }
  0x1d   :  { %161 = vmatpush1.bf16.msra.mxu1 %v1735_v6  ;;  %v1762_v32 = vld [vmem:[%s2359_s2 + $0x80] sm:$0xff]   ;;  %v1765_v34 = vld [vmem:[%s2359_s2 + $0x28] sm:$0xff]   ;;  %v1768_v37 = vld [vmem:[%s2359_s2 + $0xd0] sm:$0xff]  }
  0x1e   :  { %162 = vmatprep.subr.bf16.mxu1 %v1736_v7  ;;  %1562 = vmatpush3.bf16.msra.mxu0 %v1754_v18  ;;  %v1766_v35 = vld [vmem:[%s2359_s2 + $0x88] sm:$0xff]   ;;  %v1769_v38 = vld [vmem:[%s2359_s2 + $0x30] sm:$0xff]   ;;  %v1771_v40 = vld [vmem:[%s2359_s2 + $0x78] sm:$0xff]  }
  0x1f   :  { %1563 = vmatprep.subr.bf16.mxu0 %v1755_v19  ;;  %v1770_v39 = vld [vmem:[%s2359_s2 + $0x90] sm:$0xff]   ;;  %v1772_v41 = vld [vmem:[%s2359_s2 + $0xd8] sm:$0xff]   ;;  %v1775_v44 = vld [vmem:[%s2359_s2 + $0xe0] sm:$0xff]  }
  0x20   :  { %v1773_v42 = vld [vmem:[%s2359_s2 + $0x38] sm:$0xff]   ;;  %v1776_v45 = vld [vmem:[%s2359_s2 + $0xa0] sm:$0xff]   ;;  %v1777_v46 = vld [vmem:[%s2359_s2 + $0xe8] sm:$0xff]  }
  0x21   :  { %163 = vmatpush1.bf16.msra.mxu1 %v1738_v8  ;;  %v1774_v43 = vld [vmem:[%s2359_s2 + $0x98] sm:$0xff]   ;;  %v1778_v47 = vld [vmem:[%s2359_s2 + $0xa8] sm:$0xff]   ;;  %v1779_v48 = vld [vmem:[%s2359_s2 + $0xf0] sm:$0xff]  }
  0x22   :  { %199 = vmatprep.subr.bf16.mxu1 %v1741_v11  ;;  %1564 = vmatpush3.bf16.msra.mxu0 %v1756_v22  ;;  %v1780_v49 = vld [vmem:[%s2359_s2 + $0xb0] sm:$0xff]   ;;  %v1781_v50 = vld [vmem:[%s2359_s2 + $0xf8] sm:$0xff]   ;;  %v1783_v1 = vld [vmem:[%s2361_s4] ss:$12 sps:$4 sm:$0xff]  }
  0x23   :  { %1565 = vmatprep.subr.bf16.mxu0 %v1757_v23  ;;  %v1782_v51 = vld [vmem:[%s2359_s2 + $0xb8] sm:$0xff]   ;;  %v1785_v52 = vld [vmem:[%s2361_s4 + $0x4] ss:$12 sps:$4 sm:$0xff]   ;;  %v1786_v14 = vld [vmem:[%s2361_s4 + $0x8] ss:$12 sps:$4 sm:$0xff]  }
  0x24   :  { %1463 = vmatmul.mubr.msk.bf16.vlgmr.msra.gmra.mrb[0].mxu1 %vm152_vm0, %v55_v15  ;;  %v1789_v2 = vld [vmem:[%s2361_s4 + $0x1c] ss:$12 sps:$4 sm:$0xff]   ;;  %v1787_v3 = vld [vmem:[%s2361_s4 + $0x18] ss:$12 sps:$4 sm:$0xff]   ;;  %v1793_v16 = vld [vmem:[%s2361_s4 + $0x34] ss:$12 sps:$4 sm:$0xff]  }
  0x25   :  { %200 = vmatpush1.bf16.msra.mxu1 %v1739_v13  ;;  %231 = vmatprep.mubr.bf16.mxu1 %v1914_v0  ;;  %v1794_v18 = vld [vmem:[%s2361_s4 + $0x38] ss:$12 sps:$4 sm:$0xff]   ;;  %v1799_v23 = vld [vmem:[%s2361_s4 + $0x60] ss:$12 sps:$4 sm:$0xff]  }
  0x26   :  { %201 = vmatprep.subr.bf16.mxu1 %v1744_v17  ;;  %1566 = vmatpush3.bf16.msra.mxu0 %v1758_v26  ;;  %v1791_v17 = vld [vmem:[%s2361_s4 + $0x30] ss:$12 sps:$4 sm:$0xff]   ;;  %v1797_v19 = vld [vmem:[%s2361_s4 + $0x4c] ss:$12 sps:$4 sm:$0xff]  }
  0x27   :  { %1567 = vmatprep.subr.bf16.mxu0 %v1759_v28  ;;  %v1801_v22 = vld [vmem:[%s2361_s4 + $0x64] ss:$12 sps:$4 sm:$0xff]   ;;  %v1809_v28 = vld [vmem:[%s2361_s4 + $0x94] ss:$12 sps:$4 sm:$0xff]  }
  0x28   :  { %v1803_v26 = vld [vmem:[%s2361_s4 + $0x78] ss:$12 sps:$4 sm:$0xff]  }
  0x29   :  { %202 = vmatpush1.bf16.msra.mxu1 %v1742_v20  ;;  %v1795_v20 = vld [vmem:[%s2361_s4 + $0x48] ss:$12 sps:$4 sm:$0xff]  }
  0x2a   :  { %203 = vmatprep.subr.bf16.mxu1 %v1747_v21  ;;  %1568 = vmatpush3.bf16.msra.mxu0 %v1761_v30  ;;  %v1798_v21 = vld [vmem:[%s2361_s4 + $0x50] ss:$12 sps:$4 sm:$0xff]   ;;  %v1810_v30 = vld [vmem:[%s2361_s4 + $0x98] ss:$12 sps:$4 sm:$0xff]  }
  0x2b   :  { %1569 = vmatprep.subr.bf16.mxu0 %v1763_v31  ;;  %v1813_v31 = vld [vmem:[%s2361_s4 + $0xac] ss:$12 sps:$4 sm:$0xff]  }
  0x2d   :  { %204 = vmatpush1.bf16.msra.mxu1 %v1745_v24  ;;  %v1802_v24 = vld [vmem:[%s2361_s4 + $0x68] ss:$12 sps:$4 sm:$0xff]  }
  0x2e   :  { %205 = vmatprep.subr.bf16.mxu1 %v1750_v25  ;;  %1570 = vmatpush3.bf16.msra.mxu0 %v1765_v34  ;;  %v1805_v25 = vld [vmem:[%s2361_s4 + $0x7c] ss:$12 sps:$4 sm:$0xff]   ;;  %v2226_v34 = vld [vmem:[#allocation2 + $0x4] ss:$12 sps:$4 sm:$0xff]  }
  0x2f   :  { %1571 = vmatprep.subr.bf16.mxu0 %v1767_v36 }
  0x31   :  { %206 = vmatpush1.bf16.msra.mxu1 %v1748_v27  ;;  %v1806_v27 = vld [vmem:[%s2361_s4 + $0x80] ss:$12 sps:$4 sm:$0xff]  }
  0x32   :  { %1581 = vmatprep.subr.bf16.mxu1 %v1760_v29  ;;  %1572 = vmatpush3.bf16.msra.mxu0 %v1769_v38  ;;  %v1807_v29 = vld [vmem:[%s2361_s4 + $0x90] ss:$12 sps:$4 sm:$0xff]  }
  0x33   :  { %1573 = vmatprep.subr.bf16.mxu0 %v1771_v40 }
  0x34   :  { %1464 = vmatmul.mubr.msk.bf16.vlgmr.msra.gmra.mrb[4].mxu1 %vm152_vm0, %v55_v15  ;;  %v1790_v15 = vld [vmem:[%s2361_s4 + $0x20] ss:$12 sps:$4 sm:$0xff]  }
  0x35   :  { %1582 = vmatpush3.bf16.msra.mxu1 %v1762_v32  ;;  %v1811_v32 = vld [vmem:[%s2361_s4 + $0xa8] ss:$12 sps:$4 sm:$0xff]  }
  0x36   :  { %1583 = vmatprep.subr.bf16.mxu1 %v1764_v33  ;;  %1574 = vmatpush3.bf16.msra.mxu0 %v1773_v42  ;;  %v1814_v33 = vld [vmem:[%s2361_s4 + $0xb0] ss:$12 sps:$4 sm:$0xff]  }
  0x37   :  { %779 = vmatprep.subr.bf16.mxu0 %v1785_v52 }
  0x39   :  { %1584 = vmatpush3.bf16.msra.mxu1 %v1766_v35 }
  0x3a   :  { %1585 = vmatprep.subr.bf16.mxu1 %v1768_v37 }
  0x3d   :  { %1586 = vmatpush3.bf16.msra.mxu1 %v1770_v39 }
  0x3e   :  { %1587 = vmatprep.subr.bf16.mxu1 %v1772_v41  ;;  %v1465_v41 = vld [vmem:[%s2360_s3] ss:$0 sm:$0xff] }
  0x41   :  { %1588 = vmatpush3.bf16.msra.mxu1 %v1774_v43 }
  0x42   :  { %1589 = vmatprep.subr.bf16.mxu1 %v1775_v44 }
  0x45   :  { %1590 = vmatpush3.bf16.msra.mxu1 %v1776_v45 }
  0x46   :  { %1591 = vmatprep.subr.bf16.mxu1 %v1777_v46 }
  0x49   :  { %1592 = vmatpush3.bf16.msra.mxu1 %v1778_v47 }
  0x4a   :  { %1593 = vmatprep.subr.bf16.mxu1 %v1779_v48 }
  0x4d   :  { %1594 = vmatpush3.bf16.msra.mxu1 %v1780_v49 }
  0x4e   :  { %1595 = vmatprep.subr.bf16.mxu1 %v1781_v50 }
  0x51   :  { %1596 = vmatpush3.bf16.msra.mxu1 %v1782_v51 }
  0x52   :  { %1639 = vmatprep.subr.bf16.mxu1 %v1915_v53 }
  0xf7   :  { %v190_v54 = vpop.f32.mrb[0].mxu1 }
  0xf8   :  { %v242_v55 = vmax.f32 %v190_v54, 0.0  ;;  %v192_v56 = vpop.f32.mrb[1].mxu1 }
  0xf9   :  { %v194_v57 = vpop.f32.mrb[2].mxu1  ;;  %v243_v60 = vmax.f32 %v192_v56, 0.0  ;;  %v1836_v56 = vld [vmem:[#allocation2 + $0x8] ss:$12 sps:$4 sm:$0xff]  }
  0xfa   :  { %v246_v58 = vmax.f32 %v194_v57, 0.0  ;;  %v196_v59 = vpop.f32.mrb[3].mxu1 }
  0xfb   :  { %v247_v61 = vmax.f32 %v196_v59, 0.0  ;;  %v1818_v59 = vld [vmem:[#allocation2 + $0x18] ss:$12 sps:$4 sm:$0xff]  }
  0xfc   :  { %v250_v62 = vpack.c.bf16 %v246_v58, %v242_v55  ;;  %v1815_v55 = vld [vmem:[#allocation2] ss:$12 sps:$4 sm:$0xff]   ;;  %v1820_v58 = vld [vmem:[#allocation2 + $0x1c] ss:$12 sps:$4 sm:$0xff]  }
  0xfd   :  { %v251_v63 = vpack.c.bf16 %v247_v61, %v243_v60  ;;  %v1840_v60 = vld [vmem:[#allocation2 + $0x20] ss:$12 sps:$4 sm:$0xff]  }
  0xfe   :  { %v1823_v61 = vld [vmem:[#allocation2 + $0x34] ss:$12 sps:$4 sm:$0xff]  }
  0xff   :  { %549 = vmatprep.mubr.bf16.mxu0 %v251_v63  ;;  %v1841_v63 = vld [vmem:[#allocation2 + $0x38] ss:$12 sps:$4 sm:$0xff]  }
 0x100   :  { %550 = vmatmul.mubr.bf16.vlgmr.msra.gmra.mrb[0].mxu0 %v250_v62  ;;  %v1821_v62 = vld [vmem:[#allocation2 + $0x30] ss:$12 sps:$4 sm:$0xff]  }
 0x101   :  { %780 = vmatpush1.bf16.msra.mxu0 %v1783_v1  ;;  %811 = vmatprep.mubr.bf16.mxu0 %v1914_v0  ;;  %v1826_v1 = vld [vmem:[#allocation2 + $0x4c] ss:$12 sps:$4 sm:$0xff]  }
 0x102   :  { %781 = vmatprep.subr.bf16.mxu0 %v1789_v2  ;;  %v1824_v2 = vld [vmem:[#allocation2 + $0x48] ss:$12 sps:$4 sm:$0xff]  }
 0x105   :  { %782 = vmatpush1.bf16.msra.mxu0 %v1787_v3  ;;  %v1842_v3 = vld [vmem:[#allocation2 + $0x50] ss:$12 sps:$4 sm:$0xff]  }
 0x106   :  { %783 = vmatprep.subr.bf16.mxu0 %v1793_v16 }
 0x107   :  { %v233_v4 = vpop.f32.mrb[4].mxu1 }
 0x108   :  { %v235_v5 = vpop.f32.mrb[5].mxu1  ;;  %v244_v7 = vmax.f32 %v233_v4, 0.0  ;;  %v1829_v4 = vld [vmem:[#allocation2 + $0x64] ss:$12 sps:$4 sm:$0xff]  }
 0x109   :  { %v237_v6 = vpop.f32.mrb[6].mxu1  ;;  %v245_v10 = vmax.f32 %v235_v5, 0.0  ;;  %784 = vmatpush1.bf16.msra.mxu0 %v1791_v17  ;;  %v1827_v5 = vld [vmem:[#allocation2 + $0x60] ss:$12 sps:$4 sm:$0xff]  }
 0x10a   :  { %v248_v8 = vmax.f32 %v237_v6, 0.0  ;;  %v239_v9 = vpop.f32.mrb[7].mxu1  ;;  %785 = vmatprep.subr.bf16.mxu0 %v1797_v19  ;;  %v1843_v6 = vld [vmem:[#allocation2 + $0x68] ss:$12 sps:$4 sm:$0xff]   ;;  %v634_v19 = vld [vmem:[%s2362_s5] sm:$0x7] }
 0x10b   :  { %v249_v11 = vmax.f32 %v239_v9, 0.0  ;;  %v1844_v9 = vld [vmem:[#allocation2 + $0x80] ss:$12 sps:$4 sm:$0xff]  }
 0x10c   :  { %v252_v12 = vpack.c.bf16 %v248_v8, %v244_v7  ;;  %v1832_v7 = vld [vmem:[#allocation2 + $0x7c] ss:$12 sps:$4 sm:$0xff]   ;;  %v1830_v8 = vld [vmem:[#allocation2 + $0x78] ss:$12 sps:$4 sm:$0xff]  }
 0x10d   :  { %v253_v13 = vpack.c.bf16 %v249_v11, %v245_v10  ;;  %786 = vmatpush1.bf16.msra.mxu0 %v1795_v20  ;;  %v1835_v10 = vld [vmem:[#allocation2 + $0x94] ss:$12 sps:$4 sm:$0xff]   ;;  %v1833_v11 = vld [vmem:[#allocation2 + $0x90] ss:$12 sps:$4 sm:$0xff]  }
 0x10e   :  { %787 = vmatprep.subr.bf16.mxu0 %v1801_v22 }
 0x10f   :  { %590 = vmatprep.mubr.bf16.mxu1 %v253_v13  ;;  %v1839_v13 = vld [vmem:[#allocation2 + $0xac] ss:$12 sps:$4 sm:$0xff]  }
 0x110   :  { %591 = vmatmul.mubr.bf16.vlgmr.msra.gmra.mrb[8].mxu1 %v252_v12  ;;  %v1845_v12 = vld [vmem:[#allocation2 + $0x98] ss:$12 sps:$4 sm:$0xff]  }
 0x111   :  { %1640 = vmatpush3.bf16.msra.mxu1 %v1786_v14  ;;  %788 = vmatpush1.bf16.msra.mxu0 %v1799_v23  ;;  %v1837_v14 = vld [vmem:[#allocation2 + $0xa8] ss:$12 sps:$4 sm:$0xff]  }
 0x112   :  { %1641 = vmatprep.subr.bf16.mxu1 %v1915_v53  ;;  %789 = vmatprep.subr.bf16.mxu0 %v1805_v25 }
 0x113   :  { %1655 = vmatprep.mubr.msk.bf16.mxu1 %vm1916_vm1, %v1915_v53 }
 0x115   :  { %1642 = vmatpush3.bf16.msra.mxu1 %v1790_v15  ;;  %790 = vmatpush1.bf16.msra.mxu0 %v1803_v26  ;;  %v1846_v15 = vld [vmem:[#allocation2 + $0xb0] ss:$12 sps:$4 sm:$0xff]  }
 0x116   :  { %1643 = vmatprep.subr.bf16.mxu1 %v1915_v53  ;;  %791 = vmatprep.subr.bf16.mxu0 %v1809_v28 }
 0x119   :  { %1644 = vmatpush3.bf16.msra.mxu1 %v1794_v18  ;;  %792 = vmatpush1.bf16.msra.mxu0 %v1807_v29 }
 0x11a   :  { %1645 = vmatprep.subr.bf16.mxu1 %v1915_v53  ;;  %793 = vmatprep.subr.bf16.mxu0 %v1813_v31 }
 0x11d   :  { %1646 = vmatpush3.bf16.msra.mxu1 %v1798_v21  ;;  %794 = vmatpush1.bf16.msra.mxu0 %v1811_v32 }
 0x11e   :  { %1647 = vmatprep.subr.bf16.mxu1 %v1915_v53  ;;  %1040 = vmatprep.subr.bf16.mxu0 %v2226_v34 }
 0x121   :  { %1648 = vmatpush3.bf16.msra.mxu1 %v1802_v24 }
 0x122   :  { %1649 = vmatprep.subr.bf16.mxu1 %v1915_v53 }
 0x125   :  { %1650 = vmatpush3.bf16.msra.mxu1 %v1806_v27 }
 0x126   :  { %1651 = vmatprep.subr.bf16.mxu1 %v1915_v53 }
 0x129   :  { %1652 = vmatpush3.bf16.msra.mxu1 %v1810_v30 }
 0x12a   :  { %1653 = vmatprep.subr.bf16.mxu1 %v1915_v53 }
 0x12d   :  { %1654 = vmatpush3.bf16.msra.mxu1 %v1814_v33 }
 0x12e   :  { %1659 = vmatprep.subr.bf16.mxu1 %v1915_v53 }
 0x1d3   :  { %v1575_v35 = vpop.f32.mrb[0].mxu0 }
 0x1d4   :  { %v1576_v36 = vpop.f32.mrb[1].mxu0 }
 0x1d5   :  { %v1577_v37 = vadd.f32 %v1576_v36, %v1575_v35  ;;  %v1578_v38 = vpop.f32.mrb[2].mxu0  ;;  %v895_v35 = vld [vmem:[%s2364_s7] sm:$0x7] }
 0x1d6   :  { %v1579_v39 = vpop.f32.mrb[3].mxu0 }
 0x1d7   :  { %v1580_v40 = vadd.f32 %v1579_v39, %v1578_v38  ;;  %v552_v44 = vadd.f32 %v1577_v37, %v1465_v41 }
 0x1d9   :  { %v555_v48 = vadd.f32 %v1580_v40, %v1465_v41 }
 0x1e3   :  { %v1597_v42 = vpop.f32.mrb[8].mxu1 }
 0x1e4   :  { %v1598_v43 = vpop.f32.mrb[9].mxu1 }
 0x1e5   :  { %v1599_v45 = vadd.f32 %v1598_v43, %v1597_v42  ;;  %v1600_v46 = vpop.f32.mrb[10].mxu1 }
 0x1e6   :  { %v1601_v47 = vpop.f32.mrb[11].mxu1 }
 0x1e7   :  { %v593_v49 = vadd.f32 %v1599_v45, %v552_v44  ;;  %v1602_v50 = vadd.f32 %v1601_v47, %v1600_v46 }
 0x1e9   :  { %v596_v51 = vadd.f32 %v1602_v50, %v555_v48  ;;  %v599_v52 = vmax.f32 %v593_v49, 0.0 }
 0x1eb   :  { %v600_v54 = vmax.f32 %v596_v51, 0.0 }
 0x1ed   :  { %v601_v57 = vpack.c.bf16 %v600_v54, %v599_v52 }
 0x1ef   :  { %812 = vmatmul.mubr.bf16.vlgmr.msra.gmra.mrb[4].mxu0 %v601_v57  ;;  %1656 = vmatmul.mubr.bf16.vlgmr.msra.gmra.mrb[12].mxu1 %v601_v57 }
 0x1f0   :  { %1041 = vmatpush1.bf16.msra.mxu0 %v1815_v55  ;;  %1660 = vmatpush3.bf16.msra.mxu1 %v1836_v56 }
 0x1f1   :  { %1042 = vmatprep.subr.bf16.mxu0 %v1820_v58  ;;  %1661 = vmatprep.subr.bf16.mxu1 %v1915_v53 }
 0x1f2   :  { %1072 = vmatprep.mubr.bf16.mxu0 %v1914_v0  ;;  %1675 = vmatprep.mubr.msk.bf16.mxu1 %vm1916_vm1, %v1915_v53 }
 0x1f4   :  { %1043 = vmatpush1.bf16.msra.mxu0 %v1818_v59  ;;  %1662 = vmatpush3.bf16.msra.mxu1 %v1840_v60 }
 0x1f5   :  { %1044 = vmatprep.subr.bf16.mxu0 %v1823_v61  ;;  %1663 = vmatprep.subr.bf16.mxu1 %v1915_v53 }
 0x1f8   :  { %1045 = vmatpush1.bf16.msra.mxu0 %v1821_v62  ;;  %1664 = vmatpush3.bf16.msra.mxu1 %v1841_v63 }
 0x1f9   :  { %1046 = vmatprep.subr.bf16.mxu0 %v1826_v1  ;;  %1665 = vmatprep.subr.bf16.mxu1 %v1915_v53 }
 0x1fc   :  { %1047 = vmatpush1.bf16.msra.mxu0 %v1824_v2  ;;  %1666 = vmatpush3.bf16.msra.mxu1 %v1842_v3 }
 0x1fd   :  { %1048 = vmatprep.subr.bf16.mxu0 %v1829_v4  ;;  %1667 = vmatprep.subr.bf16.mxu1 %v1915_v53 }
 0x200   :  { %1049 = vmatpush1.bf16.msra.mxu0 %v1827_v5  ;;  %1668 = vmatpush3.bf16.msra.mxu1 %v1843_v6 }
 0x201   :  { %1050 = vmatprep.subr.bf16.mxu0 %v1832_v7  ;;  %1669 = vmatprep.subr.bf16.mxu1 %v1915_v53 }
 0x204   :  { %1051 = vmatpush1.bf16.msra.mxu0 %v1830_v8  ;;  %1670 = vmatpush3.bf16.msra.mxu1 %v1844_v9 }
 0x205   :  { %1052 = vmatprep.subr.bf16.mxu0 %v1835_v10  ;;  %1671 = vmatprep.subr.bf16.mxu1 %v1915_v53 }
 0x208   :  { %1053 = vmatpush1.bf16.msra.mxu0 %v1833_v11  ;;  %1672 = vmatpush3.bf16.msra.mxu1 %v1845_v12 }
 0x209   :  { %1054 = vmatprep.subr.bf16.mxu0 %v1839_v13  ;;  %1673 = vmatprep.subr.bf16.mxu1 %v1915_v53 }
 0x20c   :  { %1055 = vmatpush1.bf16.msra.mxu0 %v1837_v14  ;;  %1674 = vmatpush3.bf16.msra.mxu1 %v1846_v15 }
 0x20d   :  { %1143 = vmatprep.subr.bf16.mxu0 %v2226_v34  ;;  %1679 = vmatprep.subr.bf16.mxu1 %v1915_v53 }
 0x20f   :  { %1073 = vmatmul.mubr.bf16.vlgmr.msra.gmra.mrb[8].mxu0 %v1914_v0  ;;  %1676 = vmatmul.mubr.bf16.vlgmr.msra.gmra.mrb[16].mxu1 %v1914_v0 }
 0x210   :  { %1144 = vmatpush1.bf16.msra.mxu0 %v1815_v55  ;;  %1680 = vmatpush3.bf16.msra.mxu1 %v1836_v56 }
 0x211   :  { %1145 = vmatprep.subr.bf16.mxu0 %v1820_v58  ;;  %1681 = vmatprep.subr.bf16.mxu1 %v1915_v53 }
 0x212   :  { %1175 = vmatprep.mubr.bf16.mxu0 %v1914_v0  ;;  %1695 = vmatprep.mubr.msk.bf16.mxu1 %vm1916_vm1, %v1915_v53  ;;  %v636_v0 = vlaneseq }
 0x214   :  { %1146 = vmatpush1.bf16.msra.mxu0 %v1818_v59  ;;  %1682 = vmatpush3.bf16.msra.mxu1 %v1840_v60  ;;  %v637_v16 = vshrl.u32 %v636_v0, 7 }
 0x215   :  { %1147 = vmatprep.subr.bf16.mxu0 %v1823_v61  ;;  %1683 = vmatprep.subr.bf16.mxu1 %v1915_v53 }
 0x216   :  { %v638_v17 = vsub.s32 0, %v637_v16  ;;  %v646_v18 = vsub.s32 2, %v637_v16  ;;  %v642_v20 = vsub.s32 1, %v637_v16  ;;  %v1854_v16 = vld [vmem:[%s2365_s8 + $0x38] sm:$0xff]  }
 0x218   :  { %1148 = vmatpush1.bf16.msra.mxu0 %v1821_v62  ;;  %1684 = vmatpush3.bf16.msra.mxu1 %v1841_v63  ;;  %v639_v23 = vrot.slane %v634_v19, %v638_v17  ;;  %v647_v24 = vrot.slane %v634_v19, %v646_v18  ;;  %v643_v27 = vrot.slane %v634_v19, %v642_v20 }
 0x219   :  { %1149 = vmatprep.subr.bf16.mxu0 %v1826_v1  ;;  %1685 = vmatprep.subr.bf16.mxu1 %v1915_v53  ;;  %v2273_v36 = vrot.slane %v895_v35, %v638_v17  ;;  %v2275_v37 = vrot.slane %v895_v35, %v642_v20  ;;  %v2279_v57 = vrot.slane %v895_v35, %v646_v18 }
 0x21c   :  { %1150 = vmatpush1.bf16.msra.mxu0 %v1824_v2  ;;  %1686 = vmatpush3.bf16.msra.mxu1 %v1842_v3 }
 0x21d   :  { %1151 = vmatprep.subr.bf16.mxu0 %v1829_v4  ;;  %1687 = vmatprep.subr.bf16.mxu1 %v1915_v53 }
 0x220   :  { %1152 = vmatpush1.bf16.msra.mxu0 %v1827_v5  ;;  %1688 = vmatpush3.bf16.msra.mxu1 %v1843_v6 }
 0x221   :  { %1153 = vmatprep.subr.bf16.mxu0 %v1832_v7  ;;  %1689 = vmatprep.subr.bf16.mxu1 %v1915_v53 }
 0x224   :  { %1154 = vmatpush1.bf16.msra.mxu0 %v1830_v8  ;;  %1690 = vmatpush3.bf16.msra.mxu1 %v1844_v9  ;;  %v1847_v9 = vld [vmem:[%s2365_s8] sm:$0xff]  }
 0x225   :  { %1155 = vmatprep.subr.bf16.mxu0 %v1835_v10  ;;  %1691 = vmatprep.subr.bf16.mxu1 %v1915_v53  ;;  %v1848_v10 = vld [vmem:[%s2365_s8 + $0x8] sm:$0xff]  }
 0x228   :  { %1156 = vmatpush1.bf16.msra.mxu0 %v1833_v11  ;;  %1692 = vmatpush3.bf16.msra.mxu1 %v1845_v12  ;;  %v1849_v11 = vld [vmem:[%s2365_s8 + $0x10] sm:$0xff]   ;;  %v1850_v12 = vld [vmem:[%s2365_s8 + $0x18] sm:$0xff]  }
 0x229   :  { %1157 = vmatprep.subr.bf16.mxu0 %v1839_v13  ;;  %1693 = vmatprep.subr.bf16.mxu1 %v1915_v53  ;;  %v1851_v13 = vld [vmem:[%s2365_s8 + $0x20] sm:$0xff]  }
 0x22c   :  { %1158 = vmatpush1.bf16.msra.mxu0 %v1837_v14  ;;  %1694 = vmatpush3.bf16.msra.mxu1 %v1846_v15  ;;  %v1852_v14 = vld [vmem:[%s2365_s8 + $0x28] sm:$0xff]   ;;  %v1853_v15 = vld [vmem:[%s2365_s8 + $0x30] sm:$0xff]  }
 0x22d   :  { %1699 = vmatprep.subr.bf16.mxu0 %v1915_v53 }
 0x2c2   :  { %v813_v21 = vpop.f32.mrb[4].mxu0  ;;  %v856_v22 = vpop.f32.mrb[12].mxu1 }
 0x2c3   :  { %v815_v25 = vpop.f32.mrb[5].mxu0  ;;  %v1657_v26 = vpop.f32.mrb[13].mxu1  ;;  %v814_v40 = vadd.f32 %v813_v21, %v639_v23  ;;  %v857_v62 = vadd.f32 %v856_v22, %v647_v24 }
 0x2c4   :  { %v817_v28 = vpop.f32.mrb[6].mxu0  ;;  %v859_v29 = vpop.f32.mrb[14].mxu1  ;;  %v816_v44 = vadd.f32 %v815_v25, %v643_v27 }
 0x2c5   :  { %v2264_v30 = vadd.f32 %v817_v28, %v639_v23  ;;  %v2266_v31 = vadd.f32 %v859_v29, %v647_v24  ;;  %v819_v32 = vpop.f32.mrb[7].mxu0  ;;  %v1658_v33 = vpop.f32.mrb[15].mxu1 }
 0x2c6   :  { %v2268_v34 = vadd.f32 %v819_v32, %v643_v27 }
 0x2e2   :  { %v1074_v38 = vpop.f32.mrb[8].mxu0  ;;  %v1115_v39 = vpop.f32.mrb[16].mxu1 }
 0x2e3   :  { %v1075_v41 = vadd.f32 %v1074_v38, %v2273_v36  ;;  %v1076_v42 = vpop.f32.mrb[9].mxu0  ;;  %v1677_v43 = vpop.f32.mrb[17].mxu1  ;;  %v1116_v60 = vadd.f32 %v1115_v39, %v2279_v57 }
 0x2e4   :  { %v1077_v45 = vadd.f32 %v1076_v42, %v2275_v37  ;;  %v1078_v46 = vpop.f32.mrb[10].mxu0  ;;  %v1118_v47 = vpop.f32.mrb[18].mxu1 }
 0x2e5   :  { %v1121_v48 = vadd.f32 %v1075_v41, %v814_v40  ;;  %v1079_v49 = vpop.f32.mrb[11].mxu0  ;;  %v1678_v50 = vpop.f32.mrb[19].mxu1  ;;  %v2322_v46 = vand.u32 127, %v636_v0  ;;  %v1550_v47 = vld [vmem:[%s2366_s9] ss:$0 sm:$0xff] }
 0x2e6   :  { %v1128_v51 = vadd.f32 %v1077_v45, %v816_v44 }
 0x2e7   :  { %v1546_v52 = vmul.f32 -1.442695, %v1121_v48  ;;  %vm1360_vm3 = vcmp.eq.s32.totalorder %v2322_v46, 8  ;;  %vm1427_vm7 = vcmp.eq.s32.totalorder %v2322_v46, 0  ;;  %vm1430_vm8 = vcmp.eq.s32.totalorder %v2322_v46, 1 }
 0x2e8   :  { %v1547_v54 = vmul.f32 -1.442695, %v1128_v51  ;;  %vm1435_vm9 = vcmp.eq.s32.totalorder %v2322_v46, 2 }
 0x2e9   :  { %1855 = vpow2.f32 %v1546_v52 }
 0x2ea   :  { %1857 = vpow2.f32 %v1547_v54 }
 0x2f3   :  { %v1856_v55 = vpop.eup %1855 }
 0x2f4   :  { %v1125_v56 = vadd.f32 1.0, %v1856_v55  ;;  %v1858_v58 = vpop.eup %1857 }
 0x2f5   :  { %v1132_v59 = vadd.f32 1.0, %v1858_v58 }
 0x2f6   :  { %1859 = vrcp.f32 %v1125_v56 }
 0x2f7   :  { %1861 = vrcp.f32 %v1132_v59 }
 0x300   :  { %v1860_v61 = vpop.eup %1859 }
 0x301   :  { %v1135_v63 = vmul.f32 %v1860_v61, %v1116_v60  ;;  %v1862_v2 = vpop.eup %1861 }
 0x302   :  { %v1138_v3 = vsub.f32 1.0, %v1862_v2  ;;  %v1140_v6 = vmul.f32 0.0, %v1862_v2 }
 0x303   :  { %v1136_v1 = vadd.f32 %v1135_v63, %v857_v62 }
 0x305   :  { %1863 = vtanh.f32 %v1136_v1 }
 0x30f   :  { %v1864_v4 = vpop.eup %1863 }
 0x310   :  { %v1139_v5 = vmul.f32 %v1864_v4, %v1138_v3 }
 0x312   :  { %v1141_v7 = vadd.f32 %v1140_v6, %v1139_v5 }
 0x314   :  { %v1142_v8 = vpack.c.bf16 %v1141_v7, %v1141_v7 }
 0x316   :  { %1176 = vmatmul.mubr.bf16.vlgmr.msra.gmra.mrb[12].mxu0 %v1142_v8  ;;  %1696 = vmatmul.mubr.bf16.vlgmr.msra.gmra.mrb[20].mxu1 %v1142_v8 }
 0x317   :  { %1715 = vmatprep.mubr.msk.bf16.mxu0 %vm1916_vm1, %v1915_v53  ;;  %1700 = vmatpush3.bf16.msra.mxu0 %v1847_v9 }
 0x318   :  { %1701 = vmatprep.subr.bf16.mxu0 %v1915_v53 }
 0x31b   :  { %1702 = vmatpush3.bf16.msra.mxu0 %v1848_v10 }
 0x31c   :  { %1703 = vmatprep.subr.bf16.mxu0 %v1915_v53 }
 0x31f   :  { %1704 = vmatpush3.bf16.msra.mxu0 %v1849_v11 }
 0x320   :  { %1705 = vmatprep.subr.bf16.mxu0 %v1915_v53 }
 0x323   :  { %1706 = vmatpush3.bf16.msra.mxu0 %v1850_v12 }
 0x324   :  { %1707 = vmatprep.subr.bf16.mxu0 %v1915_v53 }
 0x327   :  { %1708 = vmatpush3.bf16.msra.mxu0 %v1851_v13 }
 0x328   :  { %1709 = vmatprep.subr.bf16.mxu0 %v1915_v53 }
 0x32b   :  { %1710 = vmatpush3.bf16.msra.mxu0 %v1852_v14 }
 0x32c   :  { %1711 = vmatprep.subr.bf16.mxu0 %v1915_v53 }
 0x32f   :  { %1712 = vmatpush3.bf16.msra.mxu0 %v1853_v15 }
 0x330   :  { %1713 = vmatprep.subr.bf16.mxu0 %v1915_v53 }
 0x333   :  { %1714 = vmatpush3.bf16.msra.mxu0 %v1854_v16 }
 0x3e9   :  { %v1177_v17 = vpop.f32.mrb[12].mxu0  ;;  %v1218_v18 = vpop.f32.mrb[20].mxu1 }
 0x3ea   :  { %v1178_v19 = vadd.f32 %v1177_v17, %v2273_v36  ;;  %v1179_v20 = vpop.f32.mrb[13].mxu0  ;;  %v1697_v21 = vpop.f32.mrb[21].mxu1  ;;  %v1219_v38 = vadd.f32 %v1218_v18, %v2279_v57  ;;  %v1409_v57 = vld [vmem:[%s2367_s10] sm:$0xff] }
 0x3eb   :  { %v1180_v22 = vadd.f32 %v1179_v20, %v2275_v37  ;;  %v1181_v23 = vpop.f32.mrb[14].mxu0  ;;  %v1221_v24 = vpop.f32.mrb[22].mxu1 }
 0x3ec   :  { %v1224_v25 = vadd.f32 %v1178_v19, %v2264_v30  ;;  %v1182_v26 = vpop.f32.mrb[15].mxu0  ;;  %v1698_v27 = vpop.f32.mrb[23].mxu1 }
 0x3ed   :  { %v1231_v28 = vadd.f32 %v1180_v22, %v2268_v34 }
 0x3ee   :  { %v1548_v29 = vmul.f32 -1.442695, %v1224_v25 }
 0x3ef   :  { %v1549_v53 = vmul.f32 -1.442695, %v1231_v28 }
 0x3f0   :  { %1865 = vpow2.f32 %v1548_v29 }
 0x3f1   :  { %1867 = vpow2.f32 %v1549_v53 }
 0x3fa   :  { %v1866_v32 = vpop.eup %1865 }
 0x3fb   :  { %v1228_v33 = vadd.f32 1.0, %v1866_v32  ;;  %v1868_v35 = vpop.eup %1867 }
 0x3fc   :  { %v1235_v36 = vadd.f32 1.0, %v1868_v35 }
 0x3fd   :  { %1869 = vrcp.f32 %v1228_v33 }
 0x3fe   :  { %1871 = vrcp.f32 %v1235_v36 }
 0x407   :  { %v1870_v37 = vpop.eup %1869 }
 0x408   :  { %v1238_v39 = vmul.f32 %v1870_v37, %v1219_v38  ;;  %v1872_v40 = vpop.eup %1871 }
 0x409   :  { %v1241_v41 = vsub.f32 1.0, %v1872_v40  ;;  %v1243_v43 = vmul.f32 %v1872_v40, %v1141_v7 }
 0x40a   :  { %v1239_v30 = vadd.f32 %v1238_v39, %v2266_v31 }
 0x40c   :  { %1873 = vtanh.f32 %v1239_v30 }
 0x416   :  { %v1874_v34 = vpop.eup %1873 }
 0x417   :  { %v1242_v42 = vmul.f32 %v1874_v34, %v1241_v41 }
 0x419   :  { %v1244_v44 = vadd.f32 %v1243_v43, %v1242_v42 }
 0x41b   :  { %v1245_v45 = vpack.c.bf16 %v1244_v44, %v1141_v7  ;;  %v1410_v7 = vld [vmem:[%s2367_s10 + $0x8] sm:$0xff] }
 0x41d   :  { %1716 = vmatmul.mubr.bf16.vlgmr.msra.gmra.mrb[16].mxu0 %v1245_v45 }
 0x4f0   :  { %v1351_v48 = vpop.f32.mrb[16].mxu0 }
 0x4f1   :  { %v1352_v31 = vadd.f32 %v1550_v47, %v1351_v48  ;;  %v1717_v49 = vpop.f32.mrb[17].mxu0 }
 0x4f2   :  { %v1354_v50 = vpop.f32.mrb[18].mxu0 }
 0x4f3   :  { %v1355_v51 = vadd.f32 %v1550_v47, %v1354_v50  ;;  %v1718_v52 = vpop.f32.mrb[19].mxu0  ;;  %v1371_v54 = vsel %vm1370_vm2, %v1352_v31, -inf  ;;  %v1361_v55 = vsel %vm1360_vm3, %v1352_v31, 0.0 }
 0x4f4   :  { %1372 = vmax.xlane.f32.xlu0 %v1371_v54  ;;  %v1364_v0 = vsel %vm1363_vm4, %v1361_v55, 0.0 }
 0x4f5   :  { %v1374_v56 = vsel %vm1370_vm2, %v1355_v51, -inf  ;;  %v1362_v58 = vsel %vm1360_vm3, %v1355_v51, 0.0 }
 0x4f6   :  { %v1367_v59 = vsel %vm1363_vm4, %v1362_v58, 0.0 }
 0x4f8   :  { %1375 = vmax.xlane.f32.xlu0 %v1374_v56 }
 0x50e   :  { %1412 = vperm.xlu0 %1725, %v1409_v57  }
 0x52d   :  { %1368 = vadd.xlane.f32.xlu0 %v1367_v59 }
 0x581   :  { %v1373_v60 = vpop.xlane.xlu0 %1372 }
 0x582   :  { %v1377_v61 = vsub.f32 %v1352_v31, %v1373_v60 }
 0x584   :  { %v1379_v62 = vmul.f32 1.442695, %v1377_v61 }
 0x585   :  { %v1376_v63 = vpop.xlane.xlu0 %1375 }
 0x586   :  { %1875 = vpow2.f32 %v1379_v62  ;;  %v1378_v1 = vsub.f32 %v1355_v51, %v1376_v63 }
 0x588   :  { %v1381_v2 = vmul.f32 1.442695, %v1378_v1 }
 0x58a   :  { %1877 = vpow2.f32 %v1381_v2 }
 0x58d   :  { %v1413_v11 = vpop.permute.xlu0 %1412 }
 0x58e   :  { %vm1417_vm5 = vcmp.eq.s32.totalorder %v2322_v46, %v1413_v11 }
 0x590   :  { %v1876_v3 = vpop.eup %1875 }
 0x591   :  { %v1383_v4 = vsel %vm1370_vm2, %v1876_v3, 0.0 }
 0x592   :  { %1384 = vadd.xlane.f32.xlu1 %v1383_v4 }
 0x594   :  { %v1878_v5 = vpop.eup %1877 }
 0x595   :  { %v1386_v6 = vsel %vm1370_vm2, %v1878_v5, 0.0 }
 0x596   :  { %1387 = vadd.xlane.f32.xlu1 %v1386_v6 }
 0x5a7   :  { %1415 = vperm.xlu1 %1726, %v1410_v7  }
 0x5ba   :  { %v1369_v41 = vpop.xlane.xlu0 %1368 }
 0x5bb   :  { %v1432_v43 = vsel %vm1430_vm8, %v1369_v41, 0.0 }
 0x5cb   :  { %1365 = vadd.xlane.f32.xlu1 %v1364_v0 }
 0x61f   :  { %v1385_v8 = vpop.xlane.xlu1 %1384 }
 0x620   :  { %1879 = vlog2.f32 %v1385_v8 }
 0x623   :  { %v1388_v9 = vpop.xlane.xlu1 %1387 }
 0x624   :  { %1881 = vlog2.f32 %v1388_v9 }
 0x627   :  { %v1416_v23 = vpop.permute.xlu1 %1415 }
 0x628   :  { %vm1418_vm6 = vcmp.eq.s32.totalorder %v2322_v46, %v1416_v23 }
 0x62a   :  { %v1880_v10 = vpop.eup %1879 }
 0x62b   :  { %v1390_v12 = vmul.f32 0.6931472, %v1880_v10 }
 0x62d   :  { %v1393_v13 = vsub.f32 %v1377_v61, %v1390_v12 }
 0x62e   :  { %v1882_v14 = vpop.eup %1881 }
 0x62f   :  { %v1395_v15 = vmul.f32 1.442695, %v1393_v13  ;;  %v1392_v16 = vmul.f32 0.6931472, %v1882_v14  ;;  %v1419_v17 = vsel %vm1417_vm5, %v1393_v13, 0.0 }
 0x630   :  { %v1421_v18 = vsel %vm1370_vm2, %v1419_v17, 0.0 }
 0x631   :  { %1883 = vpow2.f32 %v1395_v15  ;;  %v1394_v19 = vsub.f32 %v1378_v1, %v1392_v16  ;;  %1422 = vadd.xlane.f32.xlu1 %v1421_v18 }
 0x633   :  { %v1397_v20 = vmul.f32 1.442695, %v1394_v19  ;;  %v1420_v28 = vsel %vm1418_vm6, %v1394_v19, 0.0 }
 0x634   :  { %v1424_v29 = vsel %vm1370_vm2, %v1420_v28, 0.0 }
 0x635   :  { %1885 = vpow2.f32 %v1397_v20 }
 0x63b   :  { %v1884_v21 = vpop.eup %1883 }
 0x63c   :  { %v1399_v22 = vmul.f32 %v1884_v21, %v1393_v13 }
 0x63e   :  { %v1401_v24 = vsel %vm1370_vm2, %v1399_v22, 0.0 }
 0x63f   :  { %v1886_v25 = vpop.eup %1885  ;;  %1402 = vadd.xlane.f32.xlu1 %v1401_v24 }
 0x640   :  { %v1400_v26 = vmul.f32 %v1886_v25, %v1394_v19 }
 0x642   :  { %v1404_v27 = vsel %vm1370_vm2, %v1400_v26, 0.0 }
 0x643   :  { %1405 = vadd.xlane.f32.xlu1 %v1404_v27 }
 0x647   :  { %1425 = vadd.xlane.f32.xlu1 %v1424_v29 }
 0x658   :  { %v1366_v53 = vpop.xlane.xlu1 %1365 }
 0x659   :  { %v1431_v36 = vsel %vm1430_vm8, %v1366_v53, 0.0 }
 0x6be   :  { %v1423_v32 = vpop.xlane.xlu1 %1422 }
 0x6bf   :  { %v1428_v33 = vsel %vm1427_vm7, %v1423_v32, 0.0 }
 0x6c0   :  { %v1433_v37 = vadd.f32 %v1431_v36, %v1428_v33 }
 0x6cc   :  { %v1403_v35 = vpop.xlane.xlu1 %1402 }
 0x6cd   :  { %v1407_v38 = vsub.f32 0.0, %v1403_v35 }
 0x6cf   :  { %v1436_v39 = vsel %vm1435_vm9, %v1407_v38, 0.0 }
 0x6d0   :  { %v1438_v30 = vadd.f32 %v1436_v39, %v1433_v37  ;;  %v1406_v40 = vpop.xlane.xlu1 %1405 }
 0x6d1   :  { %v1408_v34 = vsub.f32 0.0, %v1406_v40 }
 0x6d2   :  { %1440 = vst [vmem:[%s2368_s11] sm:$0xff] %v1438_v30 }
 0x6d3   :  { %v1437_v47 = vsel %vm1435_vm9, %v1408_v34, 0.0 }
 0x6d4   :  { %v1426_v42 = vpop.xlane.xlu1 %1425 }
 0x6d5   :  { %v1429_v44 = vsel %vm1427_vm7, %v1426_v42, 0.0 }
 0x6d6   :  { %v1434_v45 = vadd.f32 %v1432_v43, %v1429_v44 }
 0x6d8   :  { %v1439_v48 = vadd.f32 %v1437_v47, %v1434_v45 }
 0x6da   :  { %1441 = vst [vmem:[%s2368_s11 + $0x8] sm:$0xff] %v1439_v48 }
 0x6db   :  { %1446 = vsyncpa [#allocation3], 1 }

</bundles_post_ra>
